<compile_context>
chip_gen: v6e
topology: v6e:2x2x1
jax: 0.10.0
libtpu: 0.0.40
codegen_flags: <defaults>
</compile_context>

<pallas_src>
import jax
import jax.numpy as jnp
from jax.experimental import pallas as pl
from jax.experimental.pallas import tpu as pltpu

# ---- synthetic config (mirrors config.dim / numItems / numUsers / padIdx) ----
D = 32            # config.dim
L = 8             # history (basket) length -> x: (B, L)
T = 8             # number of target / negative items per user -> tar/neg: (B, T)
B = 2             # batch size
N_EVAL = 16       # number of candidate items in eval mode
NUM_USERS = 16
NUM_ITEMS = 20
PAD_IDX = NUM_ITEMS   # config.padIdx

_VMEM_SPEC = pl.BlockSpec(memory_space=pltpu.MemorySpace.VMEM)


# --------------------------- training-path kernel ----------------------------
def _train_kernel(eui_ref, eli_ref, eu_ref, el_ref, off_ref, out_ref):
    # eui_ref: (B, D)          user embedding
    # eli_ref: (B, L, D)       history item embeddings
    # eu_ref : (B, 2T, D)      EIU gathered at concat([tar, neg])
    # el_ref : (B, 2T, D)      EIL gathered at concat([tar, neg])
    # off_ref: (B, 1)          per-user mean correction
    # out_ref: (B, 2T)         combined [scoreTar | scoreNeg]
    eui = eui_ref[...]                                              # (B, D)
    eli_mean = jnp.mean(eli_ref[...], axis=1) * off_ref[...]        # (B, D)

    # VPU broadcast-multiply + XLU lane-reduce over D (no MXU push/drain).
    xmf = jnp.sum(eui[:, None, :] * eu_ref[...], axis=-1)           # (B, 2T)
    xfp = jnp.sum(eli_mean[:, None, :] * el_ref[...], axis=-1)      # (B, 2T)
    out_ref[...] = xmf + xfp


def fpmc_train_scores(eui, eli, e_u, e_l, offset):
    b, two_t, _ = e_u.shape
    # Whole problem fits in VMEM many times over -> single invocation, no grid.
    return pl.pallas_call(
        _train_kernel,
        out_shape=jax.ShapeDtypeStruct((b, two_t), jnp.float32),
        in_specs=[_VMEM_SPEC] * 5,
        out_specs=_VMEM_SPEC,
    )(eui, eli, e_u, e_l, offset)


# ----------------------------- eval-path kernel ------------------------------
def _eval_kernel(eui_ref, eli_ref, etu_ref, etl_ref, off_ref, st_ref):
    # eui_ref: (B, D)  eli_ref: (B, L, D)  etu_ref / etl_ref: (N, D)
    # off_ref: (B, 1)  st_ref: (B, N)
    dn = (((1,), (1,)), ((), ()))   # contract last dims: (B,D) x (N,D) -> (B,N)
    eli_mean = jnp.mean(eli_ref[...], axis=1) * off_ref[...]        # (B, D)
    xmf = jax.lax.dot_general(eui_ref[...], etu_ref[...], dn,
                              preferred_element_type=jnp.float32)   # (B, N)
    # eTarL.mm(eli.T).T  ==  eli_mean @ eTarL.T
    xfp = jax.lax.dot_general(eli_mean, etl_ref[...], dn,
                              preferred_element_type=jnp.float32)   # (B, N)
    st_ref[...] = xmf + xfp


def fpmc_eval_scores(eui, eli, etaru, etarl, offset):
    b = eui.shape[0]
    n = etaru.shape[0]
    # TODO(synk): if N grows to the full catalog, tile the candidate axis in
    # multiples of 128 lanes with the (B,D) LHS resident across that grid axis.
    return pl.pallas_call(
        _eval_kernel,
        out_shape=jax.ShapeDtypeStruct((b, n), jnp.float32),
        in_specs=[_VMEM_SPEC] * 5,
        out_specs=_VMEM_SPEC,
    )(eui, eli, etaru, etarl, offset)


# ------------------------------- FPMC "module" -------------------------------
class FPMCJax:
    def __init__(self, dim, num_items, num_users, pad_idx, key):
        k0, k1, k2, k3 = jax.random.split(key, 4)
        s = 0.1
        self.EUI = s * jax.random.normal(k0, (num_users, dim), jnp.float32)
        self.EIU = s * jax.random.normal(k1, (num_items + 1, dim), jnp.float32)
        self.EIL = s * jax.random.normal(k2, (num_items + 1, dim), jnp.float32)
        self.ELI = s * jax.random.normal(k3, (num_items + 1, dim), jnp.float32)
        # padding_idx rows are zero (nn.Embedding(padding_idx=...))
        self.EIU = self.EIU.at[pad_idx].set(0.0)
        self.EIL = self.EIL.at[pad_idx].set(0.0)
        self.ELI = self.ELI.at[pad_idx].set(0.0)

    def forward(self, u, x, tar, neg, offset, is_eval):
        # Embedding gathers are glue (plain JAX); scoring is in Pallas.
        eui = self.EUI[u]            # (B, D)
        eli = self.ELI[x]            # (B, L, D)
        if not is_eval:
            t = tar.shape[1]
            idx = jnp.concatenate([tar, neg], axis=1)     # (B, 2T)
            e_u = self.EIU[idx]                           # (B, 2T, D)
            e_l = self.EIL[idx]                           # (B, 2T, D)
            combined = fpmc_train_scores(eui, eli, e_u, e_l, offset)  # (B, 2T)
            score_tar = combined[:, :t]
            score_neg = combined[:, t:]
            return score_tar, score_neg
        else:
            etaru = self.EIU[tar]                         # (N, D)
            etarl = self.EIL[tar]                         # (N, D)
            score_tar = fpmc_eval_scores(eui, eli, etaru, etarl, offset)
            return score_tar, 0


# ------------------------------ pure-JAX reference ----------------------------
def ref_train(eui, eli, etaru, enegu, etarl, enegl, offset):
    eli_m = eli.mean(axis=1) * offset
    st = (jnp.einsum('bd,btd->bt', eui, etaru)
          + jnp.einsum('btd,bd->bt', etarl, eli_m))
    sn = (jnp.einsum('bd,btd->bt', eui, enegu)
          + jnp.einsum('btd,bd->bt', enegl, eli_m))
    return st, sn


def ref_eval(eui, eli, etaru, etarl, offset):
    eli_m = eli.mean(axis=1) * offset
    return eui @ etaru.T + eli_m @ etarl.T


# ------------------------------------ main ------------------------------------
if __name__ == "__main__":
    key = jax.random.PRNGKey(0)
    k_model, k_u, k_x, k_t, k_n = jax.random.split(key, 5)

    model = FPMCJax(D, NUM_ITEMS, NUM_USERS, PAD_IDX, k_model)

    u = jax.random.randint(k_u, (B,), 0, NUM_USERS, dtype=jnp.int32)
    x = jax.random.randint(k_x, (B, L), 0, NUM_ITEMS, dtype=jnp.int32)
    tar = jax.random.randint(k_t, (B, T), 0, NUM_ITEMS, dtype=jnp.int32)
    neg = jax.random.randint(k_n, (B, T), 0, NUM_ITEMS, dtype=jnp.int32)
    offset = jnp.array([[1.0], [1.25]], dtype=jnp.float32)   # per-user mean correction

    # --- training path (isEval=False) ---
    score_tar, score_neg = model.forward(u, x, tar, neg, offset, is_eval=False)
    jax.block_until_ready((score_tar, score_neg))

    st_ref, sn_ref = ref_train(model.EUI[u], model.ELI[x], model.EIU[tar],
                               model.EIU[neg], model.EIL[tar], model.EIL[neg],
                               offset)
    assert score_tar.shape == (B, T) and score_neg.shape == (B, T)
    assert jnp.allclose(score_tar, st_ref, atol=1e-5, rtol=1e-5)
    assert jnp.allclose(score_neg, sn_ref, atol=1e-5, rtol=1e-5)

    # --- eval path (isEval=True): shared candidate item list ---
    tar_eval = (jnp.arange(N_EVAL, dtype=jnp.int32) % NUM_ITEMS)
    score_eval, score_neg_eval = model.forward(u, x, tar_eval, None, offset,
                                               is_eval=True)
    jax.block_until_ready(score_eval)

    se_ref = ref_eval(model.EUI[u], model.ELI[x], model.EIU[tar_eval],
                      model.EIL[tar_eval], offset)
    assert score_eval.shape == (B, N_EVAL) and score_neg_eval == 0
    assert jnp.allclose(score_eval, se_ref, atol=1e-5, rtol=1e-5)

    print("KERNEL_OK")
</pallas_src>

<mosaic_0001>
module attributes {stable_mosaic.version = 11 : i64} {
  func.func @_train_kernel(%arg0: memref<2x32xf32, #tpu.memory_space<vmem>>, %arg1: memref<2x8x32xf32, #tpu.memory_space<vmem>>, %arg2: memref<2x16x32xf32, #tpu.memory_space<vmem>>, %arg3: memref<2x16x32xf32, #tpu.memory_space<vmem>>, %arg4: memref<2x1xf32, #tpu.memory_space<vmem>>, %arg5: memref<2x16xf32, #tpu.memory_space<vmem>>) attributes {dimension_semantics = [], scalar_prefetch = 0 : i64, scratch_operands = 0 : i64, tpu.core_type = #tpu.core_type<tc>} {
    %c0 = arith.constant 0 : index
    %c0_0 = arith.constant 0 : index
    %0 = vector.load %arg0[%c0, %c0_0] : memref<2x32xf32, #tpu.memory_space<vmem>>, vector<2x32xf32>
    %c0_1 = arith.constant 0 : index
    %c0_2 = arith.constant 0 : index
    %c0_3 = arith.constant 0 : index
    %1 = vector.load %arg1[%c0_1, %c0_2, %c0_3] : memref<2x8x32xf32, #tpu.memory_space<vmem>>, vector<2x8x32xf32>
    %cst = arith.constant dense<0.000000e+00> : vector<2x32xf32>
    %2 = vector.multi_reduction <add>, %1, %cst [1] : vector<2x8x32xf32> to vector<2x32xf32>
    %cst_4 = arith.constant 8.000000e+00 : f32
    %3 = vector.broadcast %cst_4 : f32 to vector<2x32xf32>
    %4 = arith.divf %2, %3 : vector<2x32xf32>
    %c0_5 = arith.constant 0 : index
    %c0_6 = arith.constant 0 : index
    %5 = vector.load %arg4[%c0_5, %c0_6] : memref<2x1xf32, #tpu.memory_space<vmem>>, vector<2x1xf32>
    %6 = vector.broadcast %5 : vector<2x1xf32> to vector<2x32xf32>
    %7 = arith.mulf %4, %6 : vector<2x32xf32>
    %8 = vector.shape_cast %0 : vector<2x32xf32> to vector<2x1x32xf32>
    %c0_7 = arith.constant 0 : index
    %c0_8 = arith.constant 0 : index
    %c0_9 = arith.constant 0 : index
    %9 = vector.load %arg2[%c0_7, %c0_8, %c0_9] : memref<2x16x32xf32, #tpu.memory_space<vmem>>, vector<2x16x32xf32>
    %10 = vector.broadcast %8 : vector<2x1x32xf32> to vector<2x16x32xf32>
    %11 = arith.mulf %10, %9 : vector<2x16x32xf32>
    %cst_10 = arith.constant dense<0.000000e+00> : vector<2x16xf32>
    %12 = vector.multi_reduction <add>, %11, %cst_10 [2] : vector<2x16x32xf32> to vector<2x16xf32>
    %13 = vector.shape_cast %7 : vector<2x32xf32> to vector<2x1x32xf32>
    %c0_11 = arith.constant 0 : index
    %c0_12 = arith.constant 0 : index
    %c0_13 = arith.constant 0 : index
    %14 = vector.load %arg3[%c0_11, %c0_12, %c0_13] : memref<2x16x32xf32, #tpu.memory_space<vmem>>, vector<2x16x32xf32>
    %15 = vector.broadcast %13 : vector<2x1x32xf32> to vector<2x16x32xf32>
    %16 = arith.mulf %15, %14 : vector<2x16x32xf32>
    %cst_14 = arith.constant dense<0.000000e+00> : vector<2x16xf32>
    %17 = vector.multi_reduction <add>, %16, %cst_14 [2] : vector<2x16x32xf32> to vector<2x16xf32>
    %18 = arith.addf %12, %17 : vector<2x16xf32>
    %c0_15 = arith.constant 0 : index
    %c0_16 = arith.constant 0 : index
    %19 = vector.load %arg5[%c0_15, %c0_16] : memref<2x16xf32, #tpu.memory_space<vmem>>, vector<2x16xf32>
    tpu.vector_store %arg5[%c0_15, %c0_16], %18 {strides = array<i32>} : memref<2x16xf32, #tpu.memory_space<vmem>>, vector<2x16xf32>,
    return
  }
}

</mosaic_0001>

<bundles_post_ra>
// kernel: tpu_custom_call.1
= control target key start
LH: loop header
LB: loop body
LE: loop exit
PB: predicated region body
PF: predicated region fallthrough
CT: control target
= control target key end

     0   :  { %10 = vsyncpa [#allocation3], 0  ;;  %s395_s0 = inlined_call_operand.vmem [shape: f32[2,32], index: 0, kind: input, shape index: {}]   ;;  %s396_s1 = inlined_call_operand.hbm [shape: f32[2,8,32], index: 1, kind: input, shape index: {}]   ;;  %s397_s2 = inlined_call_operand.hbm [shape: f32[2,16,32], index: 2, kind: input, shape index: {}]   ;;  %s398_s3 = inlined_call_operand.hbm [shape: f32[2,16,32], index: 3, kind: input, shape index: {}]   ;;  %s399_s4 = inlined_call_operand.vmem [shape: f32[2,1], index: 4, kind: input, shape index: {}]   ;;  %s400_s5 = inlined_call_operand.hbm [shape: f32[2,16], index: 5, kind: output, shape index: {}]  }
   0x1   :  { %11 = vsyncpa [#allocation6], 0 }
   0x2   :  { %12 = vsyncpa [#allocation4], 0  ;;  %s321_s18 = smov [#allocation5]   ;;  %s322_s20 = smov [#allocation2]  }
   0x3   :  { %s32_s19 = sshll.u32 %s321_s18, 4  ;;  %s20_s21 = sshll.u32 %s322_s20, 4  ;;  %s33_s19 = int_to_ptr.vmem [resolvable:$true] %s32_s19  ;;  %s21_s21 = int_to_ptr.vmem [resolvable:$true] %s20_s21 }
   0x4   :  { %s243_s22 = scalar_lea.vmem %s33_s19, 512  ;;  %p248_p1 = scmp.lt.s32.totalorder %s33_s19, %s33_s19 }
   0x5   :  { %p244_p0 = scmp.ne.s32.totalorder %s33_s19, %s243_s22  ;;  %p249_p2 = scmp.lt.s32.totalorder %s243_s22, %s243_s22 }
   0x7   :  { %p250_p3 = por %p249_p2, %p248_p1 }
   0x9   :  { %p251_p4 = pnand %p250_p3, %p244_p0 }
   0xb   :  { %254 = shalt.err (!%p251_p4)
}
   0xc   :  { %s323_s23 = smov 128   ;;  %s324_s24 = smov 8  }
   0xd   :  { %38 = dma.hbm_to_vmem [thread:$0]  %s397_s2, 512, %s33_s19, [#allocation6], %s323_s23, %s323_s23, %s324_s24  }
   0xe   :  { %s263_s27 = scalar_lea.vmem %s21_s21, 256  ;;  %p268_p6 = scmp.lt.s32.totalorder %s21_s21, %s21_s21 }
   0xf   :  { %p264_p5 = scmp.ne.s32.totalorder %s21_s21, %s263_s27  ;;  %p269_p7 = scmp.lt.s32.totalorder %s263_s27, %s263_s27 }
  0x11   :  { %p270_p8 = por %p269_p7, %p268_p6 }
  0x13   :  { %p271_p9 = pnand %p270_p8, %p264_p5 }
  0x15   :  { %274 = shalt.err (!%p271_p9)
}
  0x16   :  { %26 = dma.hbm_to_vmem [thread:$0]  %s396_s1, 256, %s21_s21, [#allocation3], %s323_s23, %s323_s23, %s324_s24  }
  0x17   :  { %s325_s30 = smov [#allocation7]  }
  0x18   :  { %s44_s6 = sshll.u32 %s325_s30, 4  ;;  %s45_s6 = int_to_ptr.vmem [resolvable:$true] %s44_s6 }
  0x19   :  { %s283_s7 = scalar_lea.vmem %s45_s6, 512  ;;  %p288_p11 = scmp.lt.s32.totalorder %s45_s6, %s45_s6 }
  0x1a   :  { %p284_p10 = scmp.ne.s32.totalorder %s45_s6, %s283_s7  ;;  %p289_p12 = scmp.lt.s32.totalorder %s283_s7, %s283_s7 }
  0x1c   :  { %p290_p13 = por %p289_p12, %p288_p11 }
  0x1e   :  { %p291_p0 = pnand %p290_p13, %p284_p10 }
  0x20   :  { %294 = shalt.err (!%p291_p0)
}
  0x21   :  { %50 = dma.hbm_to_vmem [thread:$0]  %s398_s3, 512, %s45_s6, [#allocation6], %s323_s23, %s323_s23, %s324_s24  }
  0x22   :  { %315 = dma.done.wait [#allocation3], 256  }
  0x23   :  { %316 = vsyncadd [#allocation3], 4294967040 }
  0x24   :  { %317 = dma.done.wait [#allocation6], 1024  }
  0x25   :  { %318 = vsyncadd [#allocation6], 4294966272  ;;  %v105_v0 = vlaneseq  ;;  %v326_v1 = vmov 0   ;;  %v327_v2 = vmov 1966171168   ;;  %v117_v12 = vld [vmem:[#allocation5 + $0x8] sm:$0xff] }
  0x26   :  { %234 = vset.pattern.permute.xlu0 %v326_v1  ;;  %v103_v3 = vunpack.c.l.s4 %v327_v2  ;;  %v83_v8 = vld [vmem:[%s399_s4] sm:$0x3]  ;;  %vm65_vm0 = vcmask 261120   ;;  %v119_v18 = vld [vmem:[#allocation5 + $0x18] sm:$0xff]  ;;  %v116_v24 = vld [vmem:[#allocation5] sm:$0xff]  ;;  %vm193_vm1 = vcmask 130112  }
  0x27   :  { %v369_v4 = vshrl.u32 %v105_v0, 7  ;;  %v225_v9 = vld.sshfl [vmem:[%s395_s0] sm:$0x11 pattern:$0x75316420]  ;;  %86 = vperm.xlu0 %234, %v83_v8   ;;  %v64_v28 = vld [vmem:[#allocation2 + $0x8] sm:$0xff] }
  0x28   :  { %v104_v5 = vunpack.c.0.s8 %v103_v3  ;;  %v101_v11 = vcombine.high %v225_v9, %v225_v9  ;;  %v118_v15 = vld [vmem:[#allocation5 + $0x10] sm:$0xff]  ;;  %v73_v30 = vsel %vm65_vm0, %v64_v28, 0.0  ;;  %v146_v48 = vld [vmem:[#allocation7] sm:$0xff]  ;;  %v147_v51 = vld [vmem:[#allocation7 + $0x8] sm:$0xff]  ;;  %s328_s0 = smov [#allocation8]   ;;  %vm204_vm2 = vcmask 1041409  }
  0x29   :  { %v122_v7 = vsub.s32 0, %v369_v4  ;;  %v63_v27 = vld [vmem:[#allocation2] sm:$0xff]  ;;  %v74_v32 = vrot.slane %v73_v30, 4  ;;  %v149_v59 = vld [vmem:[#allocation7 + $0x18] sm:$0xff]  ;;  %s215_s4 = sshll.u32 %s328_s0, 4  ;;  %vm207_vm3 = vcmask 123904   ;;  %s216_s4 = int_to_ptr.vmem [resolvable:$true] %s215_s4 }
  0x2a   :  { %v107_v6 = vsub.s32 %v104_v5, %v369_v4  ;;  %v66_v29 = vsel %vm65_vm0, %v63_v27, 0.0  ;;  %v148_v56 = vld [vmem:[#allocation7 + $0x10] sm:$0xff]  ;;  %v183_v5 = vand.u32 127, %v105_v0  ;;  %s295_s11 = scalar_lea.vmem %s216_s4, 32  ;;  %p300_p2 = scmp.lt.s32.totalorder %s216_s4, %s216_s4 }
  0x2b   :  { %v67_v31 = vrot.slane %v66_v29, 4  ;;  %v75_v34 = vadd.f32 %v74_v32, %v73_v30  ;;  %p296_p1 = scmp.ne.s32.totalorder %s216_s4, %s295_s11  ;;  %p301_p3 = scmp.lt.s32.totalorder %s295_s11, %s295_s11 }
  0x2c   :  { %v108_v10 = vrot.slane %v225_v9, %v107_v6  ;;  %v115_v14 = vrot.slane %v101_v11, %v107_v6 }
  0x2d   :  { %v68_v33 = vadd.f32 %v67_v31, %v66_v29  ;;  %v76_v36 = vrot.slane %v75_v34, 2  ;;  %p302_p4 = por %p301_p3, %p300_p2 }
  0x2e   :  { %v123_v13 = vrot.slane %v108_v10, %v122_v7  ;;  %v127_v17 = vrot.slane %v115_v14, %v122_v7 }
  0x2f   :  { %v69_v35 = vrot.slane %v68_v33, 2  ;;  %v77_v38 = vadd.f32 %v76_v36, %v75_v34  ;;  %p303_p5 = pnand %p302_p4, %p296_p1 }
  0x30   :  { %v131_v16 = vmul.f32 %v123_v13, %v117_v12  ;;  %v132_v20 = vmul.f32 %v127_v17, %v118_v15  ;;  %v133_v22 = vmul.f32 %v127_v17, %v119_v18  ;;  %v130_v25 = vmul.f32 %v123_v13, %v116_v24 }
  0x31   :  { %v70_v37 = vadd.f32 %v69_v35, %v68_v33  ;;  %v78_v40 = vrot.slane %v77_v38, 1  ;;  %v186_v12 = vsub.s32 %v183_v5, %v369_v4 }
  0x32   :  { %v137_v19 = vsel %vm65_vm0, %v131_v16, 0.0  ;;  %v140_v21 = vsel %vm65_vm0, %v132_v20, 0.0  ;;  %v143_v23 = vsel %vm65_vm0, %v133_v22, 0.0  ;;  %v134_v26 = vsel %vm65_vm0, %v130_v25, 0.0 }
  0x33   :  { %138 = vadd.xlane.f32.xlu1 %v137_v19  ;;  %v71_v39 = vrot.slane %v70_v37, 1  ;;  %v79_v42 = vadd.f32 %v78_v40, %v77_v38 }
  0x35   :  { %v72_v41 = vadd.f32 %v71_v39, %v70_v37  ;;  %v82_v44 = vmul.f32 0.125, %v79_v42 }
  0x37   :  { %141 = vadd.xlane.f32.xlu1 %v140_v21  ;;  %v81_v43 = vmul.f32 0.125, %v72_v41 }
  0x3b   :  { %144 = vadd.xlane.f32.xlu1 %v143_v23 }
  0x46   :  { %135 = vadd.xlane.f32.xlu0 %v134_v26 }
  0xa2   :  { %v87_v45 = vpop.permute.xlu0 %86 }
  0xa3   :  { %v88_v46 = vrot.slane %v87_v45, 1  ;;  %v91_v47 = vmul.f32 %v87_v45, %v81_v43 }
  0xa5   :  { %v92_v49 = vmul.f32 %v88_v46, %v82_v44  ;;  %v153_v50 = vrot.slane %v91_v47, %v122_v7 }
  0xa7   :  { %v158_v52 = vmul.f32 %v153_v50, %v146_v48  ;;  %v159_v54 = vmul.f32 %v153_v50, %v147_v51  ;;  %v157_v55 = vrot.slane %v92_v49, %v122_v7  ;;  %v188_v7 = vadd.s32 4294967288, %v183_v5 }
  0xa9   :  { %v162_v53 = vsel %vm65_vm0, %v158_v52, 0.0  ;;  %v165_v57 = vsel %vm65_vm0, %v159_v54, 0.0  ;;  %v160_v58 = vmul.f32 %v157_v55, %v148_v56  ;;  %v161_v61 = vmul.f32 %v157_v55, %v149_v59 }
  0xaa   :  { %163 = vadd.xlane.f32.xlu1 %v162_v53  ;;  %v191_v10 = vsub.s32 %v188_v7, %v369_v4 }
  0xab   :  { %v168_v60 = vsel %vm65_vm0, %v160_v58, 0.0  ;;  %v171_v62 = vsel %vm65_vm0, %v161_v61, 0.0 }
  0xae   :  { %166 = vadd.xlane.f32.xlu1 %v165_v57 }
  0xb2   :  { %169 = vadd.xlane.f32.xlu1 %v168_v60 }
  0xb6   :  { %172 = vadd.xlane.f32.xlu1 %v171_v62 }
  0xbc   :  { %v139_v63 = vpop.xlane.xlu1 %138 }
  0xc0   :  { %v142_v1 = vpop.xlane.xlu1 %141 }
  0xc4   :  { %v145_v2 = vpop.xlane.xlu1 %144 }
  0xcf   :  { %v136_v8 = vpop.xlane.xlu0 %135 }
 0x133   :  { %v164_v3 = vpop.xlane.xlu1 %163 }
 0x134   :  { %v174_v13 = vadd.f32 %v164_v3, %v136_v8 }
 0x136   :  { %v187_v18 = vrot.slane %v174_v13, %v186_v12 }
 0x137   :  { %v167_v6 = vpop.xlane.xlu1 %166 }
 0x138   :  { %v175_v11 = vadd.f32 %v167_v6, %v139_v63 }
 0x13a   :  { %v192_v16 = vrot.slane %v175_v11, %v191_v10 }
 0x13b   :  { %v170_v9 = vpop.xlane.xlu1 %169 }
 0x13c   :  { %v176_v14 = vadd.f32 %v170_v9, %v142_v1  ;;  %v194_v20 = vsel %vm193_vm1, %v192_v16, %v187_v18 }
 0x13e   :  { %v198_v19 = vrot.slane %v176_v14, %v186_v12 }
 0x13f   :  { %v173_v15 = vpop.xlane.xlu1 %172 }
 0x140   :  { %v177_v17 = vadd.f32 %v173_v15, %v145_v2 }
 0x142   :  { %v202_v0 = vrot.slane %v177_v17, %v191_v10 }
 0x144   :  { %v203_v21 = vsel %vm193_vm1, %v202_v0, %v198_v19 }
 0x145   :  { %v205_v22 = vsel %vm204_vm2, %v203_v21, %v194_v20 }
 0x146   :  { %208 = vst.msk [vmem:[#allocation8] sm:$0x3] %vm207_vm3, %v205_v22 }
 0x147   :  { %306 = shalt.err (!%p303_p5)
}
 0x148   :  { %218 = dma.vmem_to_hbm [thread:$0]  %s216_s4, 32, %s400_s5, [#allocation4]  }
 0x149   :  { %319 = dma.done.wait [#allocation4], 32  }
 0x14a   :  { %320 = vsyncadd [#allocation4], 4294967264 }
 0x14b   :  { %222 = vsyncpa [#allocation3], 1 }
 0x14c   :  { %223 = vsyncpa [#allocation6], 1 }
 0x14d   :  { %224 = vsyncpa [#allocation4], 1 }

</bundles_post_ra>
